<compile_context>
chip_gen: v6e
topology: v6e:2x2x1
jax: 0.10.0
libtpu: 0.0.40
codegen_flags: <defaults>
</compile_context>

<pallas_src>
import jax
import jax.numpy as jnp
from jax.experimental import pallas as pl
from jax.experimental.pallas import tpu as pltpu


def _dense_layer_kernel(x_ref, w_ref, epi_ref, o_ref):
    """Fused conv3x3 + bias + ReLU + channel-concat for a block of batch elements.

    x_ref   : (bb, H, W*Cin)            lane-dense NHWC input slab
    w_ref   : (3*W*Cin, W*Ctot)         folded block-Toeplitz weight (conv taps +
                                        identity passthrough columns for x)
    epi_ref : (2, W*Ctot)               row 0 = bias (0 on x cols),
                                        row 1 = ReLU floor (-inf on x cols, 0 on conv cols)
    o_ref   : (bb, H, W*Ctot)           concat([x, relu(conv(x))]) slab
    """
    bb, H, wc = x_ref.shape
    wct = o_ref.shape[2]

    x3 = x_ref[...]                                       # (bb, H, wc)
    dt = x3.dtype

    # Row-shifted neighbours (per batch element) for the kh=0 / kh=2 taps.
    # Zero rows at the top/bottom borders implement the 'same' vertical padding.
    zrow = jnp.zeros((bb, 1, wc), dt)
    up = jnp.concatenate([zrow, x3[:, :-1, :]], axis=1)   # row h-1 feeds output row h
    dn = jnp.concatenate([x3[:, 1:, :], zrow], axis=1)    # row h+1 feeds output row h

    # One wide MXU matmul: K = 3*W*Cin, N = W*Ctot.  Horizontal padding, the nine
    # conv taps, channel mixing and the x-passthrough identity are all folded
    # into w_ref, so the result lands directly in the lane-dense NHWC layout.
    lhs = jnp.concatenate([up, x3, dn], axis=2).reshape(bb * H, 3 * wc)
    z = jnp.dot(lhs, w_ref[...], preferred_element_type=jnp.float32)

    # Epilogue (f32 VPU work, hidden under MXU/DMA slack on all generations):
    # bias add (zeros on passthrough columns) + ReLU on conv columns only.
    epi = epi_ref[...].astype(jnp.float32)
    z = jnp.maximum(z + epi[0:1, :], epi[1:2, :])

    o_ref[...] = z.reshape(bb, H, wct).astype(o_ref.dtype)


def fold_dense_layer_params(weight_oihw, bias, W, dtype=jnp.float32):
    """Fold conv weights into the block-Toeplitz matmul form. Call ONCE per weight
    update (not per forward).  Use dtype=jnp.bfloat16 on v5e/v6e/v7x to halve the
    dominant HBM transfer and hit the native bf16 MXU.

    Column layout of every output slab: column  w*Ctot + k  with
      k in [0, Cin)     -> passthrough of x[:, h, w, k]   (identity, center row only)
      k in [Cin, Ctot)  -> conv output channel k-Cin at spatial position w
    Row layout of the folded weight: row  kh*W*Cin + b*Cin + ci  multiplies
      x[h + kh - 1, b, ci]  (the LHS segments are [x_{h-1} | x_h | x_{h+1}]).
    """
    w_hwio = jnp.transpose(weight_oihw, (2, 3, 1, 0)).astype(dtype)  # OIHW -> HWIO
    KH, KW, Cin, Cout = w_hwio.shape
    assert (KH, KW) == (3, 3), "DenseLayer uses a 3x3 convolution"
    Ctot = Cin + Cout

    ident_blk = jnp.concatenate(
        [jnp.eye(Cin, dtype=dtype), jnp.zeros((Cin, Cout), dtype)], axis=1)   # (Cin, Ctot)

    blocks = []
    for kh in range(KH):
        acc = jnp.zeros((W * Cin, W * Ctot), dtype)
        for kw in range(KW):
            # S[b, w] = 1 iff input column b feeds output column w for tap kw
            # (b = w + kw - 1); out-of-range taps simply vanish => zero padding.
            shift = jnp.eye(W, W, k=1 - kw, dtype=dtype)
            conv_blk = jnp.concatenate(
                [jnp.zeros((Cin, Cin), dtype), w_hwio[kh, kw]], axis=1)       # (Cin, Ctot)
            acc = acc + jnp.kron(shift, conv_blk)
        if kh == 1:  # center row: x passes through untouched into the first Cin cols
            acc = acc + jnp.kron(jnp.eye(W, dtype=dtype), ident_blk)
        blocks.append(acc)
    w_big = jnp.concatenate(blocks, axis=0)                # (3*W*Cin, W*Ctot)

    bias_row = jnp.tile(
        jnp.concatenate([jnp.zeros((Cin,), dtype), bias.astype(dtype)]), W)
    floor_row = jnp.tile(
        jnp.concatenate([jnp.full((Cin,), -jnp.inf, dtype),
                         jnp.zeros((Cout,), dtype)]), W)
    epi = jnp.stack([bias_row, floor_row], axis=0)         # (2, W*Ctot)
    return w_big, epi


def _pick_batch_block(n):
    # Raise matmul M by batching rows, but keep >= 2 grid steps (v7x has 2 TCs
    # fed by the "parallel" axis) and bound VMEM/vreg pressure.
    target = max(1, min(8, n // 2))
    for bb in range(target, 0, -1):
        if n % bb == 0:
            return bb
    return 1


def dense_layer_forward_nhwc(x_nhwc, w_big, epi, *, batch_block=None):
    """concat([x, relu(conv3x3_same(x))], channel) in NHWC, folded params supplied."""
    N, H, W, Cin = x_nhwc.shape
    assert w_big.shape[0] == 3 * W * Cin, "folded weight does not match input shape"
    Ctot = w_big.shape[1] // W

    if batch_block is None:
        batch_block = _pick_batch_block(N)
    assert N % batch_block == 0

    x_slab = x_nhwc.reshape(N, H, W * Cin).astype(w_big.dtype)   # free: same HBM layout

    out_slab = pl.pallas_call(
        _dense_layer_kernel,
        out_shape=jax.ShapeDtypeStruct((N, H, W * Ctot), x_nhwc.dtype),
        grid_spec=pltpu.PrefetchScalarGridSpec(
            num_scalar_prefetch=0,
            grid=(N // batch_block,),
            in_specs=[
                pl.BlockSpec((batch_block, H, W * Cin), lambda n: (n, 0, 0)),
                pl.BlockSpec((3 * W * Cin, W * Ctot), lambda n: (0, 0)),   # resident
                pl.BlockSpec((2, W * Ctot), lambda n: (0, 0)),             # resident
            ],
            out_specs=pl.BlockSpec((batch_block, H, W * Ctot), lambda n: (n, 0, 0)),
        ),
        compiler_params=pltpu.CompilerParams(
            dimension_semantics=("parallel",),
            vmem_limit_bytes=32 * 1024 * 1024,
        ),
    )(x_slab, w_big, epi)

    return out_slab.reshape(N, H, W, Ctot)                 # free: same HBM layout


def dense_layer_forward(x_nchw, weight_oihw, bias):
    """PyTorch-layout convenience API (NCHW in / NCHW out).  NOTE: this re-folds
    the weights and transposes layouts every call; for repeated forwards, call
    fold_dense_layer_params() once and dense_layer_forward_nhwc() directly."""
    W = x_nchw.shape[3]
    w_big, epi = fold_dense_layer_params(weight_oihw, bias, W, dtype=x_nchw.dtype)
    x_nhwc = jnp.transpose(x_nchw, (0, 2, 3, 1))
    out_nhwc = dense_layer_forward_nhwc(x_nhwc, w_big, epi)
    return jnp.transpose(out_nhwc, (0, 3, 1, 2))


if __name__ == "__main__":
    N, Cin, H, W = 2, 4, 16, 16
    Cout = 8

    key = jax.random.PRNGKey(0)
    kx, kw_key, kb_key = jax.random.split(key, 3)
    x = jax.random.normal(kx, (N, Cin, H, W), dtype=jnp.float32)
    fan_in = Cin * 3 * 3
    bound = 1.0 / (fan_in ** 0.5)
    weight = jax.random.uniform(kw_key, (Cout, Cin, 3, 3), jnp.float32, -bound, bound)
    bias = jax.random.uniform(kb_key, (Cout,), jnp.float32, -bound, bound)

    # Reference: XLA convolution at highest precision.
    ref_conv = jax.lax.conv_general_dilated(
        x, weight, window_strides=(1, 1), padding="SAME",
        dimension_numbers=("NCHW", "OIHW", "NCHW"),
        precision=jax.lax.Precision.HIGHEST,
    ) + bias.reshape(1, Cout, 1, 1)
    ref = jnp.concatenate([x, jnp.maximum(ref_conv, 0.0)], axis=1)

    # ---- Hoisted path: fold once per weight update, keep NHWC end-to-end. ----
    w_big, epi = fold_dense_layer_params(weight, bias, W)          # f32 fold, done once
    x_nhwc = jnp.transpose(x, (0, 2, 3, 1))                        # layout glue, done once

    fwd = jax.jit(dense_layer_forward_nhwc)
    out_nhwc = jax.block_until_ready(fwd(x_nhwc, w_big, epi))
    out = jnp.transpose(out_nhwc, (0, 3, 1, 2))
    assert out.shape == (N, Cin + Cout, H, W)
    err = float(jnp.max(jnp.abs(out - ref)))
    assert jnp.allclose(out, ref, atol=1e-4, rtol=1e-4), f"f32 max abs err = {err}"

    # ---- bf16 path (recommended on v5e/v6e/v7x: half HBM traffic, native MXU). ----
    w_big_bf, epi_bf = fold_dense_layer_params(weight, bias, W, dtype=jnp.bfloat16)
    out_bf_nhwc = jax.block_until_ready(
        fwd(x_nhwc.astype(jnp.bfloat16), w_big_bf, epi_bf))
    out_bf = jnp.transpose(out_bf_nhwc, (0, 3, 1, 2)).astype(jnp.float32)
    err_bf = float(jnp.max(jnp.abs(out_bf - ref)))
    assert jnp.allclose(out_bf, ref, atol=1e-1, rtol=5e-2), f"bf16 max abs err = {err_bf}"

    print("KERNEL_OK")
</pallas_src>

<mosaic_0001>
module attributes {stable_mosaic.version = 11 : i64} {
  func.func @_dense_layer_kernel(%arg0: i32, %arg1: memref<1x16x64xf32, #tpu.memory_space<vmem>>, %arg2: memref<192x192xf32, #tpu.memory_space<vmem>>, %arg3: memref<2x192xf32, #tpu.memory_space<vmem>>, %arg4: memref<1x16x192xf32, #tpu.memory_space<vmem>>) attributes {dimension_semantics = [#tpu.dimension_semantics<parallel>], iteration_bounds = array<i64: 2>, scalar_prefetch = 0 : i64, scratch_operands = 0 : i64, tpu.core_type = #tpu.core_type<tc>, window_params = [{transform_indices = @transform_0, window_bounds = array<i64: 1, 16, 64>}, {pipeline_mode = #tpu.pipeline_mode<synchronous>, transform_indices = @transform_1, window_bounds = array<i64: 192, 192>}, {pipeline_mode = #tpu.pipeline_mode<synchronous>, transform_indices = @transform_2, window_bounds = array<i64: 2, 192>}, {transform_indices = @transform_3, window_bounds = array<i64: 1, 16, 192>}]} {
    %c0 = arith.constant 0 : index
    %c0_0 = arith.constant 0 : index
    %c0_1 = arith.constant 0 : index
    %0 = vector.load %arg1[%c0, %c0_0, %c0_1] : memref<1x16x64xf32, #tpu.memory_space<vmem>>, vector<1x16x64xf32>
    %cst = arith.constant 0.000000e+00 : f32
    %1 = vector.broadcast %cst : f32 to vector<1x1x64xf32>
    %2 = vector.extract_strided_slice %0 {offsets = [0, 0, 0], sizes = [1, 15, 64], strides = [1, 1, 1]} : vector<1x16x64xf32> to vector<1x15x64xf32>
    %3 = tpu.concatenate %1, %2 in 1 : vector<1x1x64xf32>, vector<1x15x64xf32> -> vector<1x16x64xf32>
    %4 = vector.extract_strided_slice %0 {offsets = [0, 1, 0], sizes = [1, 15, 64], strides = [1, 1, 1]} : vector<1x16x64xf32> to vector<1x15x64xf32>
    %5 = tpu.concatenate %4, %1 in 1 : vector<1x15x64xf32>, vector<1x1x64xf32> -> vector<1x16x64xf32>
    %6 = tpu.concatenate %3, %0, %5 in 2 : vector<1x16x64xf32>, vector<1x16x64xf32>, vector<1x16x64xf32> -> vector<1x16x192xf32>
    %7 = vector.shape_cast %6 : vector<1x16x192xf32> to vector<16x192xf32>
    %c0_2 = arith.constant 0 : index
    %c0_3 = arith.constant 0 : index
    %8 = vector.load %arg2[%c0_2, %c0_3] : memref<192x192xf32, #tpu.memory_space<vmem>>, vector<192x192xf32>
    %cst_4 = arith.constant dense<0.000000e+00> : vector<16x192xf32>
    %9 = tpu.matmul %7, %8, %cst_4 {dimension_numbers = #tpu.dot_dimension_numbers<[1], [0], [0], [1], [0, 0, 1, 1], [], []>} : vector<16x192xf32>, vector<192x192xf32>, vector<16x192xf32> -> vector<16x192xf32>
    %c0_5 = arith.constant 0 : index
    %c0_6 = arith.constant 0 : index
    %10 = vector.load %arg3[%c0_5, %c0_6] : memref<2x192xf32, #tpu.memory_space<vmem>>, vector<2x192xf32>
    %11 = vector.extract_strided_slice %10 {offsets = [0, 0], sizes = [1, 192], strides = [1, 1]} : vector<2x192xf32> to vector<1x192xf32>
    %12 = vector.broadcast %11 : vector<1x192xf32> to vector<16x192xf32>
    %13 = arith.addf %9, %12 : vector<16x192xf32>
    %14 = vector.extract_strided_slice %10 {offsets = [1, 0], sizes = [1, 192], strides = [1, 1]} : vector<2x192xf32> to vector<1x192xf32>
    %15 = vector.broadcast %14 : vector<1x192xf32> to vector<16x192xf32>
    %16 = arith.maximumf %13, %15 : vector<16x192xf32>
    %17 = vector.shape_cast %16 : vector<16x192xf32> to vector<1x16x192xf32>
    %c0_7 = arith.constant 0 : index
    %c0_8 = arith.constant 0 : index
    %c0_9 = arith.constant 0 : index
    %18 = vector.load %arg4[%c0_7, %c0_8, %c0_9] : memref<1x16x192xf32, #tpu.memory_space<vmem>>, vector<1x16x192xf32>
    tpu.vector_store %arg4[%c0_7, %c0_8, %c0_9], %17 {strides = array<i32>} : memref<1x16x192xf32, #tpu.memory_space<vmem>>, vector<1x16x192xf32>,
    return
  }
  func.func @transform_0(%arg0: i32) -> (i32, i32, i32) {
    %c0_i32 = arith.constant 0 : i32
    %c0_i32_0 = arith.constant 0 : i32
    %c0_i32_1 = arith.constant 0 : i32
    return %arg0, %c0_i32, %c0_i32_0 : i32, i32, i32
  }
  func.func @transform_1(%arg0: i32) -> (i32, i32) {
    %c0_i32 = arith.constant 0 : i32
    %c0_i32_0 = arith.constant 0 : i32
    %c0_i32_1 = arith.constant 0 : i32
    return %c0_i32, %c0_i32_0 : i32, i32
  }
  func.func @transform_2(%arg0: i32) -> (i32, i32) {
    %c0_i32 = arith.constant 0 : i32
    %c0_i32_0 = arith.constant 0 : i32
    %c0_i32_1 = arith.constant 0 : i32
    return %c0_i32, %c0_i32_0 : i32, i32
  }
  func.func @transform_3(%arg0: i32) -> (i32, i32, i32) {
    %c0_i32 = arith.constant 0 : i32
    %c0_i32_0 = arith.constant 0 : i32
    %c0_i32_1 = arith.constant 0 : i32
    return %arg0, %c0_i32, %c0_i32_0 : i32, i32, i32
  }
}

</mosaic_0001>

<bundles_post_ra>
// kernel: dense_layer_forward_nhwc.1
= control target key start
LH: loop header
LB: loop body
LE: loop exit
PB: predicated region body
PF: predicated region fallthrough
CT: control target
= control target key end

     0   :  { %s534_s12 = smov 0   ;;  %s727_s0 = inlined_call_operand.vmem [shape: f32[2,16,64], index: 0, kind: input, shape index: {}]   ;;  %s728_s1 = inlined_call_operand.vmem [shape: f32[192,192], index: 1, kind: input, shape index: {}]   ;;  %s729_s2 = inlined_call_operand.vmem [shape: f32[2,192], index: 2, kind: input, shape index: {}]   ;;  %s730_s3 = inlined_call_operand.vmem [shape: f32[2,16,192], index: 3, kind: output, shape index: {}]  }
   0x1 LB: > { %s428_s13 = sadd.s32 4294967295, %s511_s12   ;;  %p432_p0 = scmp.ge.s32.totalorder %s511_s12, 1  ;;  %s511_s12 = sphi %s534_s12, %s13_s12  }
   0x2   : > { %p137_p1 = scmp.lt.s32.totalorder %s511_s12, 3 }
   0x4   : > { %p138_p2 = pnand %p432_p0, %p137_p1 }
   0x5   : > { %p161_p3 = scmp.lt.s32.totalorder (!%p138_p2), %s428_s13, 1  ;;  %s513_s15 = smov (!%p138_p2), 64  }
   0x6   : > { %141 = sbr.rel (%p138_p2) target bundleno = 338 (0x152), region = 32 }
   0xb   : > { %v228_v0 = vld [vmem:[%s728_s1 + $0xf8] sm:$0xff]  ;;  %v227_v1 = vld [vmem:[%s728_s1 + $0xf0] sm:$0xff]  ;;  %v226_v2 = vld [vmem:[%s728_s1 + $0xe8] sm:$0xff]  ;;  %s732_s13 = smov (!%p161_p3, %s428_s13), 1  ;;  %vm175_vm0 = vcmask 1040384   ;;  %vm182_vm1 = vcmask 1046528  }
   0xc   : > { %270 = vmatprep.subr.mxu0 %v228_v0  ;;  %443 = vmatprep.subr.mxu1 %v228_v0  ;;  %v225_v3 = vld [vmem:[%s728_s1 + $0xe0] sm:$0xff]  ;;  %v224_v4 = vld [vmem:[%s728_s1 + $0xd8] sm:$0xff]  ;;  %v223_v5 = vld [vmem:[%s728_s1 + $0xd0] sm:$0xff]  ;;  %s441_s26 = sshll.u32 %s732_s13, 4  ;;  %vm194_vm2 = vcmask 523264   ;;  %v247_v0 = vlaneseq  ;;  %s442_s17 = sshll.u32 %s732_s13, 5 }
   0xd   : > { %271 = vmatpush1.msra.mxu0 %v227_v1  ;;  %467 = vmatpush1.msra.mxu1 %v227_v1  ;;  %v222_v6 = vld [vmem:[%s728_s1 + $0xc8] sm:$0xff]  ;;  %s165_s4 = scalar_lea.vmem %s727_s0, %s441_s26  ;;  %v221_v7 = vld [vmem:[%s728_s1 + $0xc0] sm:$0xff]  ;;  %v220_v10 = vld [vmem:[%s728_s1 + $0xb8] sm:$0xff]  ;;  %s170_s20 = scalar_lea.vmem %s730_s3, %s442_s17 }
   0xe   : > { %272 = vmatprep.subr.mxu0 %v226_v2  ;;  %444 = vmatprep.subr.mxu1 %v226_v2  ;;  %v572_v8 = vld [vmem:[%s165_s4] sm:$0xff]  ;;  %v574_v9 = vld [vmem:[%s165_s4 + $0x8] sm:$0xff]  ;;  %v219_v13 = vld [vmem:[%s728_s1 + $0xb0] sm:$0xff]  ;;  %v248_v1 = vshrl.u32 %v247_v0, 7 }
   0xf   : > { %273 = vmatpush1.msra.mxu0 %v225_v3  ;;  %468 = vmatpush1.msra.mxu1 %v225_v3  ;;  %v177_v11 = vrot.slane %v574_v9, 7  ;;  %v500_v12 = vpack.i.bf16 %v574_v9, %v572_v8  ;;  %v218_v14 = vld [vmem:[%s728_s1 + $0xa8] sm:$0xff]  ;;  %v176_v15 = vrot.slane %v572_v8, 7  ;;  %v217_v16 = vld [vmem:[%s728_s1 + $0xa0] sm:$0xff]  ;;  %v216_v17 = vld [vmem:[%s728_s1 + $0x98] sm:$0xff]  ;;  %v183_v51 = vrot.slane %v572_v8, 1 }
  0x10   : > { %274 = vmatprep.subr.mxu0 %v224_v4  ;;  %445 = vmatprep.subr.mxu1 %v224_v4  ;;  %v215_v19 = vld [vmem:[%s728_s1 + $0x90] sm:$0xff]  ;;  %v214_v20 = vld [vmem:[%s728_s1 + $0x88] sm:$0xff]  ;;  %v213_v21 = vld [vmem:[%s728_s1 + $0x80] sm:$0xff]  ;;  %v184_v52 = vrot.slane %v574_v9, 1  ;;  %v249_v2 = vsub.s32 0, %v248_v1  ;;  %v349_v4 = vsub.s32 1, %v248_v1 }
  0x11   : > { %275 = vmatpush1.msra.mxu0 %v223_v5  ;;  %469 = vmatpush1.msra.mxu1 %v223_v5  ;;  %v598_v18 = vsel %vm175_vm0, %v176_v15, %v177_v11  ;;  %v212_v22 = vld [vmem:[%s728_s1 + $0x78] sm:$0xff]  ;;  %v211_v23 = vld [vmem:[%s728_s1 + $0x70] sm:$0xff]  ;;  %v210_v24 = vld [vmem:[%s728_s1 + $0x68] sm:$0xff]  ;;  %v181_v59 = vsel %vm175_vm0, 0.0, %v176_v15  ;;  %v253_v5 = vsub.s32 2, %v248_v1 }
  0x12   : > { %276 = vmatprep.subr.mxu0 %v222_v6  ;;  %446 = vmatprep.subr.mxu1 %v222_v6  ;;  %v209_v25 = vld [vmem:[%s728_s1 + $0x60] sm:$0xff]  ;;  %v208_v26 = vld [vmem:[%s728_s1 + $0x58] sm:$0xff]  ;;  %v207_v27 = vld [vmem:[%s728_s1 + $0x50] sm:$0xff]  ;;  %v185_v56 = vsel %vm182_vm1, %v183_v51, %v184_v52  ;;  %v187_v57 = vsel %vm182_vm1, %v184_v52, 0.0 }
  0x13   : > { %277 = vmatpush1.msra.mxu0 %v221_v7  ;;  %470 = vmatpush1.msra.mxu1 %v221_v7  ;;  %v206_v28 = vld [vmem:[%s728_s1 + $0x48] sm:$0xff]  ;;  %v205_v29 = vld [vmem:[%s728_s1 + $0x40] sm:$0xff]  ;;  %v204_v30 = vld [vmem:[%s728_s1 + $0x38] sm:$0xff]  ;;  %v353_v7 = vsub.s32 3, %v248_v1 }
  0x14   : > { %501 = vrot.lane.b32.xlu0 %v500_v12, %s513_s15  ;;  %278 = vmatprep.subr.mxu0 %v220_v10  ;;  %v203_v31 = vld [vmem:[%s728_s1 + $0x30] sm:$0xff]  ;;  %v202_v32 = vld [vmem:[%s728_s1 + $0x28] sm:$0xff]  ;;  %v201_v33 = vld [vmem:[%s728_s1 + $0x20] sm:$0xff] }
  0x15   : > { %447 = vmatprep.subr.mxu1 %v220_v10  ;;  %279 = vmatpush1.msra.mxu0 %v219_v13  ;;  %v200_v34 = vld [vmem:[%s728_s1 + $0x18] sm:$0xff]  ;;  %v199_v35 = vld [vmem:[%s728_s1 + $0x10] sm:$0xff]  ;;  %v198_v36 = vld [vmem:[%s728_s1 + $0x8] sm:$0xff] }
  0x16   : > { %471 = vmatpush1.msra.mxu1 %v219_v13  ;;  %280 = vmatprep.subr.mxu0 %v218_v14  ;;  %v197_v37 = vld [vmem:[%s728_s1] sm:$0xff]  ;;  %v244_v38 = vld [vmem:[%s728_s1 + $0x178] sm:$0xff]  ;;  %v243_v39 = vld [vmem:[%s728_s1 + $0x170] sm:$0xff] }
  0x17   : > { %448 = vmatprep.subr.mxu1 %v218_v14  ;;  %281 = vmatpush1.msra.mxu0 %v217_v16  ;;  %v242_v40 = vld [vmem:[%s728_s1 + $0x168] sm:$0xff]  ;;  %v241_v41 = vld [vmem:[%s728_s1 + $0x160] sm:$0xff]  ;;  %v240_v42 = vld [vmem:[%s728_s1 + $0x158] sm:$0xff] }
  0x18   : > { %472 = vmatpush1.msra.mxu1 %v217_v16  ;;  %282 = vmatprep.subr.mxu0 %v216_v17  ;;  %v239_v43 = vld [vmem:[%s728_s1 + $0x150] sm:$0xff]  ;;  %v238_v44 = vld [vmem:[%s728_s1 + $0x148] sm:$0xff]  ;;  %v237_v45 = vld [vmem:[%s728_s1 + $0x140] sm:$0xff] }
  0x19   : > { %449 = vmatprep.subr.mxu1 %v216_v17  ;;  %283 = vmatpush1.msra.mxu0 %v215_v19  ;;  %v236_v46 = vld [vmem:[%s728_s1 + $0x138] sm:$0xff]  ;;  %v235_v47 = vld [vmem:[%s728_s1 + $0x130] sm:$0xff]  ;;  %v234_v48 = vld [vmem:[%s728_s1 + $0x128] sm:$0xff] }
  0x1a   : > { %473 = vmatpush1.msra.mxu1 %v215_v19  ;;  %284 = vmatprep.subr.mxu0 %v214_v20  ;;  %v233_v49 = vld [vmem:[%s728_s1 + $0x120] sm:$0xff]  ;;  %v232_v50 = vld [vmem:[%s728_s1 + $0x118] sm:$0xff]  ;;  %v231_v53 = vld [vmem:[%s728_s1 + $0x110] sm:$0xff] }
  0x1b   : > { %450 = vmatprep.subr.mxu1 %v214_v20  ;;  %285 = vmatpush1.msra.mxu0 %v213_v21  ;;  %v230_v54 = vld [vmem:[%s728_s1 + $0x108] sm:$0xff]  ;;  %v229_v55 = vld [vmem:[%s728_s1 + $0x100] sm:$0xff] }
  0x1c   : > { %474 = vmatpush1.msra.mxu1 %v213_v21  ;;  %286 = vmatprep.subr.mxu0 %v212_v22  ;;  %v245_v3 = vld [vmem:[%s729_s2] sm:$0xf] }
  0x1d   : > { %451 = vmatprep.subr.mxu1 %v212_v22  ;;  %287 = vmatpush1.msra.mxu0 %v211_v23  ;;  %v250_v6 = vrot.slane %v245_v3, %v249_v2  ;;  %v350_v8 = vrot.slane %v245_v3, %v349_v4  ;;  %v254_v9 = vrot.slane %v245_v3, %v253_v5 }
  0x1e   : > { %475 = vmatpush1.msra.mxu1 %v211_v23  ;;  %288 = vmatprep.subr.mxu0 %v210_v24  ;;  %v354_v11 = vrot.slane %v245_v3, %v353_v7 }
  0x1f   : > { %452 = vmatprep.subr.mxu1 %v210_v24  ;;  %289 = vmatpush1.msra.mxu0 %v209_v25  ;;  %v260_v10 = vrot.slane %v250_v6, %v249_v2  ;;  %v360_v12 = vrot.slane %v350_v8, %v349_v4  ;;  %v264_v13 = vrot.slane %v254_v9, %v249_v2 }
  0x20   : > { %476 = vmatpush1.msra.mxu1 %v209_v25  ;;  %290 = vmatprep.subr.mxu0 %v208_v26 }
  0x21   : > { %453 = vmatprep.subr.mxu1 %v208_v26  ;;  %291 = vmatpush1.msra.mxu0 %v207_v27 }
  0x22   : > { %477 = vmatpush1.msra.mxu1 %v207_v27  ;;  %292 = vmatprep.subr.mxu0 %v206_v28 }
  0x23   : > { %454 = vmatprep.subr.mxu1 %v206_v28  ;;  %293 = vmatpush1.msra.mxu0 %v205_v29 }
  0x24   : > { %478 = vmatpush1.msra.mxu1 %v205_v29  ;;  %294 = vmatprep.subr.mxu0 %v204_v30 }
  0x25   : > { %455 = vmatprep.subr.mxu1 %v204_v30  ;;  %295 = vmatpush1.msra.mxu0 %v203_v31 }
  0x26   : > { %479 = vmatpush1.msra.mxu1 %v203_v31  ;;  %296 = vmatprep.subr.mxu0 %v202_v32 }
  0x27   : > { %456 = vmatprep.subr.mxu1 %v202_v32  ;;  %297 = vmatpush1.msra.mxu0 %v201_v33 }
  0x28   : > { %480 = vmatpush1.msra.mxu1 %v201_v33  ;;  %298 = vmatprep.subr.mxu0 %v200_v34 }
  0x29   : > { %457 = vmatprep.subr.mxu1 %v200_v34  ;;  %299 = vmatpush1.msra.mxu0 %v199_v35 }
  0x2a   : > { %481 = vmatpush1.msra.mxu1 %v199_v35  ;;  %300 = vmatprep.subr.mxu0 %v198_v36 }
  0x2b   : > { %458 = vmatprep.subr.mxu1 %v198_v36  ;;  %301 = vmatpush1.msra.mxu0 %v197_v37 }
  0x2c   : > { %482 = vmatpush1.msra.mxu1 %v197_v37  ;;  %318 = vmatprep.subr.mxu0 %v244_v38 }
  0x2d   : > { %459 = vmatprep.subr.mxu1 %v244_v38  ;;  %319 = vmatpush2.msra.mxu0 %v243_v39 }
  0x2e   : > { %483 = vmatpush2.msra.mxu1 %v243_v39  ;;  %320 = vmatprep.subr.mxu0 %v242_v40 }
  0x2f   : > { %460 = vmatprep.subr.mxu1 %v242_v40  ;;  %321 = vmatpush2.msra.mxu0 %v241_v41 }
  0x30   : > { %484 = vmatpush2.msra.mxu1 %v241_v41  ;;  %322 = vmatprep.subr.mxu0 %v240_v42 }
  0x31   : > { %461 = vmatprep.subr.mxu1 %v240_v42  ;;  %323 = vmatpush2.msra.mxu0 %v239_v43 }
  0x32   : > { %485 = vmatpush2.msra.mxu1 %v239_v43  ;;  %324 = vmatprep.subr.mxu0 %v238_v44 }
  0x33   : > { %462 = vmatprep.subr.mxu1 %v238_v44  ;;  %325 = vmatpush2.msra.mxu0 %v237_v45 }
  0x34   : > { %486 = vmatpush2.msra.mxu1 %v237_v45  ;;  %326 = vmatprep.subr.mxu0 %v236_v46 }
  0x35   : > { %463 = vmatprep.subr.mxu1 %v236_v46  ;;  %327 = vmatpush2.msra.mxu0 %v235_v47 }
  0x36   : > { %487 = vmatpush2.msra.mxu1 %v235_v47  ;;  %328 = vmatprep.subr.mxu0 %v234_v48 }
  0x37   : > { %464 = vmatprep.subr.mxu1 %v234_v48  ;;  %329 = vmatpush2.msra.mxu0 %v233_v49 }
  0x38   : > { %488 = vmatpush2.msra.mxu1 %v233_v49  ;;  %330 = vmatprep.subr.mxu0 %v232_v50 }
  0x39   : > { %465 = vmatprep.subr.mxu1 %v232_v50  ;;  %331 = vmatpush2.msra.mxu0 %v231_v53 }
  0x3a   : > { %489 = vmatpush2.msra.mxu1 %v231_v53  ;;  %332 = vmatprep.subr.mxu0 %v230_v54 }
  0x3b   : > { %466 = vmatprep.subr.mxu1 %v230_v54  ;;  %333 = vmatpush2.msra.mxu0 %v229_v55 }
  0x3c   : > { %490 = vmatpush2.msra.mxu1 %v229_v55  ;;  %437 = vmatprep.mubr.msk.f32.mxu0 %vm194_vm2, %v185_v56 }
  0x3d   : > { %438 = vmatprep.mubr.msk.f32.mxu1 %vm194_vm2, %v187_v57 }
  0x86   : > { %v502_v58 = vpop.permute.xlu0 %501 }
  0x87   : > { %v504_v60 = vunpack.i.h.bf16 %v502_v58  ;;  %v503_v61 = vunpack.i.l.bf16 %v502_v58 }
  0x89   : > { %v195_v62 = vsel %vm194_vm2, %v181_v59, %v503_v61  ;;  %v196_v63 = vsel %vm194_vm2, %v598_v18, %v504_v60  ;;  %v364_v18 = vrot.slane %v354_v11, %v349_v4 }
  0x8a   : > { %335 = vmatmul.mubr.f32.vlgmr.msra.gmra.mxu0 %v195_v62  ;;  %341 = vmatmul.mubr.f32.vlgmr.msra.gmra.mxu1 %v196_v63 }
 0x14a   : > { %v336_v14 = vpop.f32.mrf.mxu0  ;;  %v342_v15 = vpop.f32.mrf.mxu1 }
 0x14b   : > { %v337_v16 = vadd.f32 %v336_v14, %v260_v10  ;;  %v343_v17 = vadd.f32 %v342_v15, %v260_v10 }
 0x14c   : > { %v338_v19 = vpop.f32.mrf.mxu0  ;;  %v344_v20 = vpop.f32.mrf.mxu1 }
 0x14d   : > { %v365_v21 = vmax.f32 %v337_v16, %v360_v12  ;;  %v367_v22 = vmax.f32 %v343_v17, %v360_v12  ;;  %v339_v23 = vadd.f32 %v338_v19, %v264_v13  ;;  %v345_v24 = vadd.f32 %v344_v20, %v264_v13 }
 0x14f   : > { %369 = vst [vmem:[%s170_s20] sm:$0xff] %v365_v21  ;;  %371 = vst [vmem:[%s170_s20 + $0x10] sm:$0xff] %v367_v22  ;;  %v366_v25 = vmax.f32 %v339_v23, %v364_v18  ;;  %v368_v26 = vmax.f32 %v345_v24, %v364_v18 }
 0x151   : > { %370 = vst.msk [vmem:[%s170_s20 + $0x8] sm:$0xff] %vm194_vm2, %v366_v25  ;;  %372 = vst.msk [vmem:[%s170_s20 + $0x18] sm:$0xff] %vm194_vm2, %v368_v26 }
 0x152 PF: > { %s13_s12 = sadd.s32 1, %s511_s12  }
 0x153   : > { %p10_p4 = scmp.ge.s32.totalorder %s13_s12, 4  }
 0x155   :  { %12 = sbr.rel (!%p10_p4) target bundleno = 1 (0x1), region = 62 }

</bundles_post_ra>
